<compile_context>
chip_gen: v7x
topology: tpu7x:2x2x1
jax: 0.10.0
libtpu: 0.0.40
codegen_flags: <defaults>
</compile_context>

<pallas_src>
import jax
import jax.numpy as jnp
from jax.experimental import pallas as pl
from jax.experimental.pallas import tpu as pltpu

# Parameters from CameraApprox(1.0) — deterministic, defined in-script.
LINEAR_MAP_K = 0.5622
LINEAR_MAP_M = 0.43

# ~2 MiB per block at f32 (1 MiB at bf16). With double-buffered input + output
# that is at most ~8 MiB of VMEM — safe on every TPU generation's default
# scoped-VMEM limit, so no vmem_limit_bytes override is required.
_TARGET_BLOCK_ELEMS = 512 * 1024


def _camera_approx_inverse_kernel(x_ref, o_ref):
    """Elementwise: clamp((x - m) / k, 0, 1). Compute in f32 on the VPU."""
    x = x_ref[...].astype(jnp.float32)
    y = (x - jnp.float32(LINEAR_MAP_M)) / jnp.float32(LINEAR_MAP_K)
    o_ref[...] = jnp.clip(y, 0.0, 1.0).astype(o_ref.dtype)


def _pick_lanes(total: int):
    """Widest lane count whose (8, lanes) tile divides the flat size exactly."""
    for lanes in (1024, 512, 256, 128):
        if total % (8 * lanes) == 0:
            return lanes
    return None


def camera_approx_inverse(x: jax.Array) -> jax.Array:
    """Apply CamearApproxInverse to an NCHW (or any-shape) tensor.

    Floating inputs keep their dtype end-to-end (bf16 pass-through halves HBM
    traffic); integer inputs are cast to f32 once.
    """
    orig_shape = x.shape
    if not jnp.issubdtype(x.dtype, jnp.floating):
        x = x.astype(jnp.float32)
    dtype = x.dtype

    total = x.size
    lanes = _pick_lanes(total)
    if lanes is not None:
        # Fast path: contiguous reshape only — no pad, no slice, no extra
        # HBM pass before/after the kernel.
        rows = total // lanes
        x2d = x.reshape(rows, lanes)
        padded = False
    else:
        # Ragged flat size: pad up to a multiple of (8, 128). Padding with
        # zeros is benign for this op (clamp maps them to 0 and they are
        # sliced off afterwards).
        lanes = 128
        pad_to = 8 * lanes
        padded_total = pl.cdiv(total, pad_to) * pad_to
        x_flat = jnp.pad(jnp.ravel(x), (0, padded_total - total))
        rows = padded_total // lanes
        x2d = x_flat.reshape(rows, lanes)
        padded = True

    # Large blocks (~2 MiB f32); multiple of 8 rows; ragged last grid step is
    # handled by Pallas via pl.cdiv (no tiny-tile fallback).
    block_rows = max(8, (_TARGET_BLOCK_ELEMS // lanes) // 8 * 8)
    block_rows = min(block_rows, rows)
    grid = (pl.cdiv(rows, block_rows),)

    out2d = pl.pallas_call(
        _camera_approx_inverse_kernel,
        out_shape=jax.ShapeDtypeStruct((rows, lanes), dtype),
        grid_spec=pltpu.PrefetchScalarGridSpec(
            num_scalar_prefetch=0,
            grid=grid,
            in_specs=[pl.BlockSpec((block_rows, lanes), lambda i: (i, 0))],
            out_specs=pl.BlockSpec((block_rows, lanes), lambda i: (i, 0)),
        ),
        compiler_params=pltpu.CompilerParams(
            dimension_semantics=("parallel",),
        ),
    )(x2d)

    if padded:
        return out2d.reshape(-1)[:total].reshape(orig_shape)
    return out2d.reshape(orig_shape)


def _reference(x: jax.Array) -> jax.Array:
    x = x.astype(jnp.float32)
    return jnp.clip((x - LINEAR_MAP_M) / LINEAR_MAP_K, 0.0, 1.0)


if __name__ == "__main__":
    key = jax.random.PRNGKey(0)
    # Small NCHW input consistent with the module's image-domain usage.
    x = jax.random.uniform(key, (2, 4, 16, 16), dtype=jnp.float32)

    out = camera_approx_inverse(x)
    out = jax.block_until_ready(out)

    ref = _reference(x)
    assert out.shape == x.shape
    assert out.dtype == jnp.float32
    assert jnp.allclose(out, ref, atol=1e-6, rtol=1e-6)

    # Also exercise a ragged-size / non-f32 path once for coverage.
    x2 = jax.random.uniform(jax.random.PRNGKey(1), (3, 5, 7), dtype=jnp.bfloat16)
    out2 = jax.block_until_ready(camera_approx_inverse(x2))
    assert out2.shape == x2.shape and out2.dtype == jnp.bfloat16
    assert jnp.allclose(out2.astype(jnp.float32), _reference(x2), atol=2e-2)

    print("KERNEL_OK")
</pallas_src>

<mosaic_0001>
module attributes {stable_mosaic.version = 11 : i64} {
  func.func @_camera_approx_inverse_kernel(%arg0: i32, %arg1: memref<8x256xf32, #tpu.memory_space<vmem>>, %arg2: memref<8x256xf32, #tpu.memory_space<vmem>>) attributes {dimension_semantics = [#tpu.dimension_semantics<parallel>], iteration_bounds = array<i64: 1>, scalar_prefetch = 0 : i64, scratch_operands = 0 : i64, tpu.core_type = #tpu.core_type<tc>, window_params = [{transform_indices = @transform_0, window_bounds = array<i64: 8, 256>}, {transform_indices = @transform_1, window_bounds = array<i64: 8, 256>}]} {
    %c0 = arith.constant 0 : index
    %c0_0 = arith.constant 0 : index
    %0 = vector.load %arg1[%c0, %c0_0] : memref<8x256xf32, #tpu.memory_space<vmem>>, vector<8x256xf32>
    %cst = arith.constant 4.300000e-01 : f32
    %1 = vector.broadcast %cst : f32 to vector<8x256xf32>
    %2 = arith.subf %0, %1 : vector<8x256xf32>
    %cst_1 = arith.constant 5.622000e-01 : f32
    %3 = vector.broadcast %cst_1 : f32 to vector<8x256xf32>
    %4 = arith.divf %2, %3 : vector<8x256xf32>
    %cst_2 = arith.constant 0.000000e+00 : f32
    %cst_3 = arith.constant 1.000000e+00 : f32
    %5 = vector.broadcast %cst_2 : f32 to vector<8x256xf32>
    %6 = arith.maximumf %5, %4 : vector<8x256xf32>
    %7 = vector.broadcast %cst_3 : f32 to vector<8x256xf32>
    %8 = arith.minimumf %7, %6 : vector<8x256xf32>
    %c0_4 = arith.constant 0 : index
    %c0_5 = arith.constant 0 : index
    %9 = vector.load %arg2[%c0_4, %c0_5] : memref<8x256xf32, #tpu.memory_space<vmem>>, vector<8x256xf32>
    tpu.vector_store %arg2[%c0_4, %c0_5], %8 {strides = array<i32>} : memref<8x256xf32, #tpu.memory_space<vmem>>, vector<8x256xf32>,
    return
  }
  func.func @transform_0(%arg0: i32) -> (i32, i32) {
    %c0_i32 = arith.constant 0 : i32
    %c0_i32_0 = arith.constant 0 : i32
    return %arg0, %c0_i32 : i32, i32
  }
  func.func @transform_1(%arg0: i32) -> (i32, i32) {
    %c0_i32 = arith.constant 0 : i32
    %c0_i32_0 = arith.constant 0 : i32
    return %arg0, %c0_i32 : i32, i32
  }
}

</mosaic_0001>

<bundles_post_ra>
// kernel: tpu_custom_call.1
= control target key start
LH: loop header
LB: loop body
LE: loop exit
PB: predicated region body
PF: predicated region fallthrough
CT: control target
= control target key end

     0   :  { %6 = vsyncpa [#allocation3], 0  ;;  %s137_s0 = inlined_call_operand.hbm [shape: f32[8,256], index: 0, kind: input, shape index: {}]   ;;  %s138_s1 = inlined_call_operand.hbm [shape: f32[8,256], index: 1, kind: output, shape index: {}]  }
   0x1   :  { %7 = vsyncpa [#allocation4], 0  ;;  %s101_s6 = smov [#allocation2]   ;;  %s53_s10 = scalar_lea.hbm %s137_s0, 256 }
   0x2   :  { %s14_s7 = sshll.u32 %s101_s6, 4  ;;  %p54_p0 = scmp.ne.s32.totalorder %s137_s0, %s53_s10  ;;  %s15_s7 = int_to_ptr.vmem [resolvable:$true] %s14_s7 }
   0x3   :  { %p57_p1 = scmp.lt.u32.totalorder %s53_s10, %s137_s0 }
   0x5   :  { %p59_p2 = pnand %p57_p1, %p54_p0 }
   0x7   :  { %62 = shalt.err (!%p59_p2)
}
   0x8   :  { %s63_s15 = scalar_lea.vmem %s15_s7, 256  ;;  %p68_p4 = scmp.lt.s32.totalorder %s15_s7, %s15_s7 }
   0x9   :  { %p64_p3 = scmp.ne.s32.totalorder %s15_s7, %s63_s15  ;;  %p69_p5 = scmp.lt.s32.totalorder %s63_s15, %s63_s15 }
   0xb   :  { %p70_p6 = por %p69_p5, %p68_p4 }
   0xd   :  { %p71_p7 = pnand %p70_p6, %p64_p3 }
   0xf   :  { %74 = shalt.err (!%p71_p7)
}
  0x10   :  { %17 = dma.hbm_to_vmem [thread:$0]  %s137_s0, 256, %s15_s7, [#allocation3]  }
  0x11   :  { %97 = dma.done.wait [#allocation3], 256  }
  0x12   :  { %98 = vsyncadd [#allocation3], 4294967040  ;;  %v21_v0 = vld [vmem:[#allocation2] sm:$0xff]  ;;  %v22_v1 = vld [vmem:[#allocation2 + $0x8] sm:$0xff]  ;;  %s102_s18 = smov [#allocation5]  }
  0x13   :  { %v49_v2 = vadd.f32 -0.43, %v21_v0  ;;  %v50_v3 = vadd.f32 -0.43, %v22_v1  ;;  %s40_s19 = sshll.u32 %s102_s18, 4  ;;  %s41_s19 = int_to_ptr.vmem [resolvable:$true] %s40_s19 }
  0x14   :  { %s75_s20 = scalar_lea.vmem %s41_s19, 256  ;;  %p80_p9 = scmp.lt.s32.totalorder %s41_s19, %s41_s19 }
  0x15   :  { %v26_v4 = vmul.f32 1.7787265, %v49_v2  ;;  %v27_v5 = vmul.f32 1.7787265, %v50_v3  ;;  %p76_p8 = scmp.ne.s32.totalorder %s41_s19, %s75_s20  ;;  %p81_p10 = scmp.lt.s32.totalorder %s75_s20, %s75_s20 }
  0x17   :  { %v28_v6 = vmax.f32 %v26_v4, 0.0  ;;  %v29_v7 = vmax.f32 %v27_v5, 0.0  ;;  %p82_p11 = por %p81_p10, %p80_p9 }
  0x19   :  { %v30_v8 = vmin.f32 %v28_v6, 1.0  ;;  %v31_v9 = vmin.f32 %v29_v7, 1.0  ;;  %p83_p12 = pnand %p82_p11, %p76_p8 }
  0x1b   :  { %32 = vst [vmem:[#allocation5] sm:$0xff] %v30_v8  ;;  %33 = vst [vmem:[#allocation5 + $0x8] sm:$0xff] %v31_v9 }
  0x1c   :  { %86 = shalt.err (!%p83_p12)
}
  0x1d   :  { %s87_s22 = scalar_lea.hbm %s138_s1, 256 }
  0x1e   :  { %p88_p13 = scmp.ne.s32.totalorder %s138_s1, %s87_s22  ;;  %p91_p0 = scmp.lt.u32.totalorder %s87_s22, %s138_s1 }
  0x20   :  { %p93_p1 = pnand %p91_p0, %p88_p13 }
  0x22   :  { %96 = shalt.err (!%p93_p1)
}
  0x23   :  { %43 = dma.vmem_to_hbm [thread:$0]  %s41_s19, 256, %s138_s1, [#allocation4]  }
  0x24   :  { %99 = dma.done.wait [#allocation4], 256  }
  0x25   :  { %100 = vsyncadd [#allocation4], 4294967040 }
  0x26   :  { %47 = vsyncpa [#allocation3], 1 }
  0x27   :  { %48 = vsyncpa [#allocation4], 1 }

</bundles_post_ra>
